<compile_context>
chip_gen: v7x
topology: tpu7x:2x2x1
jax: 0.10.0
libtpu: 0.0.40
codegen_flags: <defaults>
</compile_context>

<pallas_src>
import functools

import jax
import jax.numpy as jnp
from jax.experimental import pallas as pl
from jax.experimental.pallas import tpu as pltpu

_LANE = 128                       # feature / node padding granularity (lane width)
_EPS = 1e-5
_VMEM_LIMIT = 48 * 1024 * 1024    # explicit scoped-VMEM budget (fits v7x 64 MiB)
_FUSED_MAX_NODES = 1024           # fused single-kernel path threshold (bf16 A_hat <= 2 MiB)


# ----------------------------------------------------------------------------
# small helpers
# ----------------------------------------------------------------------------
def _round_up(x, m):
    return ((x + m - 1) // m) * m


def _pad2(a, rows, cols, value=0.0):
    r, c = a.shape
    if r == rows and c == cols:
        return a
    return jnp.pad(a, ((0, rows - r), (0, cols - c)), constant_values=value)


def _choose_node_tile(n_pad):
    for t in (512, 256, 128):
        if n_pad % t == 0:
            return t
    return n_pad  # n_pad is always a multiple of 128, so never reached


def _full_spec(shape):
    # Whole-array block (used only by the fused small-graph path).
    return pl.BlockSpec(shape, lambda: tuple(0 for _ in shape))


# ----------------------------------------------------------------------------
# Pallas kernels — tiled per-layer path
# ----------------------------------------------------------------------------
def _gcn_agg_kernel(a_ref, x_ref, w_ref, b_ref, o_ref, acc_ref):
    """One (i, j, k) tile of H_pre = A_hat @ (X @ W) + b.

    The (tk, tn) XW tile is computed on the fly and streamed straight into the
    aggregation matmul, so the full [N, F_out] intermediate never exists.
    """
    @pl.when(pl.program_id(2) == 0)
    def _():
        acc_ref[...] = jnp.zeros_like(acc_ref)

    xw = jnp.dot(x_ref[...], w_ref[...], preferred_element_type=jnp.float32)
    acc_ref[...] += jnp.dot(a_ref[...], xw.astype(jnp.bfloat16),
                            preferred_element_type=jnp.float32)
    # Bias is added AFTER aggregation (GCNConv semantics).
    o_ref[...] = acc_ref[...] + b_ref[...]


def _bn_stats_kernel(h_ref, s_ref, ss_ref, *, tm, n_valid):
    """Accumulate per-feature sum / sum-of-squares over node tiles (masked)."""
    i = pl.program_id(0)

    @pl.when(i == 0)
    def _():
        s_ref[...] = jnp.zeros_like(s_ref)
        ss_ref[...] = jnp.zeros_like(ss_ref)

    row = jax.lax.broadcasted_iota(jnp.int32, h_ref.shape, 0) + i * tm
    h = jnp.where(row < n_valid, h_ref[...], 0.0)
    s_ref[...] += jnp.sum(h, axis=0, keepdims=True)
    ss_ref[...] += jnp.sum(h * h, axis=0, keepdims=True)


def _bn_act_kernel(h_ref, s_ref, ss_ref, g_ref, be_ref, o_ref, *, inv_n, eps):
    """Elementwise BN(+affine) + ReLU using precomputed sum / sumsq."""
    mean = s_ref[...] * inv_n
    var = jnp.maximum(ss_ref[...] * inv_n - mean * mean, 0.0)
    h = (h_ref[...] - mean) * jax.lax.rsqrt(var + eps)
    h = h * g_ref[...] + be_ref[...]
    o_ref[...] = jnp.maximum(h, 0.0).astype(o_ref.dtype)


def _linear_kernel(x_ref, w_ref, b_ref, o_ref):
    """Classifier tile: o = X @ W + b (bf16 MXU, f32 accumulation)."""
    xb = x_ref[...].astype(jnp.bfloat16)
    o_ref[...] = (jnp.dot(xb, w_ref[...], preferred_element_type=jnp.float32)
                  + b_ref[...]).astype(o_ref.dtype)


# ----------------------------------------------------------------------------
# Pallas kernel — fused whole-forward path (small / medium graphs)
# ----------------------------------------------------------------------------
def _make_fused_kernel(layer_num, n_valid, last_activation, eps=_EPS):
    inv_n = 1.0 / float(n_valid)

    def kernel(*refs):
        a_ref, x_ref = refs[0], refs[1]
        layer_refs = refs[2:2 + 4 * layer_num]
        wc_ref = refs[2 + 4 * layer_num]
        bc_ref = refs[3 + 4 * layer_num]
        o_ref = refs[4 + 4 * layer_num]

        a = a_ref[...]          # bf16 [N_pad, N_pad], DMA'd once, reused per layer
        h = x_ref[...]          # bf16 [N_pad, F_in_pad]

        for l in range(layer_num):
            w_r, b_r, g_r, be_r = layer_refs[4 * l:4 * l + 4]
            xw = jnp.dot(h, w_r[...], preferred_element_type=jnp.float32)
            hp = jnp.dot(a, xw.astype(jnp.bfloat16),
                         preferred_element_type=jnp.float32)
            hp = hp + b_r[...]                      # bias after aggregation
            if (l < layer_num - 1) or last_activation:
                row = jax.lax.broadcasted_iota(jnp.int32, hp.shape, 0)
                hm = jnp.where(row < n_valid, hp, 0.0)   # mask padded rows
                s = jnp.sum(hm, axis=0, keepdims=True)
                ss = jnp.sum(hm * hm, axis=0, keepdims=True)
                mean = s * inv_n
                var = jnp.maximum(ss * inv_n - mean * mean, 0.0)
                hp = (hp - mean) * jax.lax.rsqrt(var + eps) * g_r[...] + be_r[...]
                hp = jnp.maximum(hp, 0.0)
            h = hp.astype(jnp.bfloat16)

        out = jnp.dot(h, wc_ref[...], preferred_element_type=jnp.float32) + bc_ref[...]
        o_ref[...] = out

    return kernel


# ----------------------------------------------------------------------------
# pallas_call wrappers
# ----------------------------------------------------------------------------
def _gcn_aggregate(a_hat, x, w, b, *, tm, tk, tn):
    n_pad = a_hat.shape[0]
    f_in = x.shape[1]
    f_out = w.shape[1]
    grid = (n_pad // tm, f_out // tn, n_pad // tk)
    return pl.pallas_call(
        _gcn_agg_kernel,
        out_shape=jax.ShapeDtypeStruct((n_pad, f_out), jnp.float32),
        grid=grid,
        in_specs=[
            pl.BlockSpec((tm, tk), lambda i, j, k: (i, k)),        # A_hat tile
            pl.BlockSpec((tk, f_in), lambda i, j, k: (k, 0)),      # X row tile
            pl.BlockSpec((f_in, tn), lambda i, j, k: (0, j)),      # W (pinned per j)
            pl.BlockSpec((1, tn), lambda i, j, k: (0, j)),         # bias (pinned per j)
        ],
        out_specs=pl.BlockSpec((tm, tn), lambda i, j, k: (i, j)),
        scratch_shapes=[pltpu.VMEM((tm, tn), jnp.float32)],
        compiler_params=pltpu.CompilerParams(
            dimension_semantics=("parallel", "parallel", "arbitrary"),
            vmem_limit_bytes=_VMEM_LIMIT),
    )(a_hat, x, w, b)


def _bn_stats(h, *, tm, n_valid):
    n_pad, f = h.shape
    kernel = functools.partial(_bn_stats_kernel, tm=tm, n_valid=n_valid)
    return pl.pallas_call(
        kernel,
        out_shape=(jax.ShapeDtypeStruct((1, f), jnp.float32),
                   jax.ShapeDtypeStruct((1, f), jnp.float32)),
        grid=(n_pad // tm,),
        in_specs=[pl.BlockSpec((tm, f), lambda i: (i, 0))],
        out_specs=(pl.BlockSpec((1, f), lambda i: (0, 0)),
                   pl.BlockSpec((1, f), lambda i: (0, 0))),
        compiler_params=pltpu.CompilerParams(
            dimension_semantics=("arbitrary",),
            vmem_limit_bytes=_VMEM_LIMIT),
    )(h)


def _bn_act(h, s, ss, gamma, beta, *, tm, tn, n_valid):
    n_pad, f = h.shape
    kernel = functools.partial(_bn_act_kernel, inv_n=1.0 / float(n_valid), eps=_EPS)
    return pl.pallas_call(
        kernel,
        out_shape=jax.ShapeDtypeStruct((n_pad, f), jnp.bfloat16),
        grid=(n_pad // tm, f // tn),
        in_specs=[pl.BlockSpec((tm, tn), lambda i, j: (i, j)),
                  pl.BlockSpec((1, tn), lambda i, j: (0, j)),
                  pl.BlockSpec((1, tn), lambda i, j: (0, j)),
                  pl.BlockSpec((1, tn), lambda i, j: (0, j)),
                  pl.BlockSpec((1, tn), lambda i, j: (0, j))],
        out_specs=pl.BlockSpec((tm, tn), lambda i, j: (i, j)),
        compiler_params=pltpu.CompilerParams(
            dimension_semantics=("parallel", "parallel"),
            vmem_limit_bytes=_VMEM_LIMIT),
    )(h, s, ss, gamma, beta)


def _linear(x, w, b, *, tm, tn):
    n_pad, f_in = x.shape
    f_out = w.shape[1]
    return pl.pallas_call(
        _linear_kernel,
        out_shape=jax.ShapeDtypeStruct((n_pad, f_out), jnp.float32),
        grid=(n_pad // tm, f_out // tn),
        in_specs=[pl.BlockSpec((tm, f_in), lambda i, j: (i, 0)),
                  pl.BlockSpec((f_in, tn), lambda i, j: (0, j)),
                  pl.BlockSpec((1, tn), lambda i, j: (0, j))],
        out_specs=pl.BlockSpec((tm, tn), lambda i, j: (i, j)),
        compiler_params=pltpu.CompilerParams(
            dimension_semantics=("parallel", "parallel"),
            vmem_limit_bytes=_VMEM_LIMIT),
    )(x, w, b)


def _fused_forward(a_hat, x_p, layers, wc_p, bc_p, *, n_valid, last_activation):
    n_pad = a_hat.shape[0]
    out_dim = wc_p.shape[1]
    flat = []
    for (w, b, g, be) in layers:
        flat += [w, b, g, be]
    inputs = [a_hat, x_p] + flat + [wc_p, bc_p]
    kernel = _make_fused_kernel(len(layers), n_valid, last_activation)
    return pl.pallas_call(
        kernel,
        out_shape=jax.ShapeDtypeStruct((n_pad, out_dim), jnp.float32),
        in_specs=[_full_spec(t.shape) for t in inputs],
        out_specs=_full_spec((n_pad, out_dim)),
        compiler_params=pltpu.CompilerParams(vmem_limit_bytes=_VMEM_LIMIT),
    )(*inputs)


def _tiled_forward(a_hat, x_p, layers, wc_p, bc_p, *, n_valid, last_activation):
    n_pad = a_hat.shape[0]
    tm = _choose_node_tile(n_pad)
    tk = tm
    tn = _LANE
    h = x_p                                   # bf16 [N_pad, F_in_pad]
    num_layers = len(layers)
    for l, (w, b, g, be) in enumerate(layers):
        h_pre = _gcn_aggregate(a_hat, h, w, b, tm=tm, tk=tk, tn=tn)   # f32
        if (l < num_layers - 1) or last_activation:
            s, ss = _bn_stats(h_pre, tm=tm, n_valid=n_valid)
            h = _bn_act(h_pre, s, ss, g, be, tm=tm, tn=tn, n_valid=n_valid)  # bf16
        else:
            h = h_pre                                                  # f32 (cast in kernel)
    return _linear(h, wc_p, bc_p, tm=tm, tn=tn)


# ----------------------------------------------------------------------------
# model glue (plain JAX): adjacency, padding, parameter init, reference
# ----------------------------------------------------------------------------
def _dense_norm_adj(edge_index, edge_weight, num_nodes):
    """A_hat = D^{-1/2} (A + I) D^{-1/2}, dense f32, from COO edge_index."""
    if edge_weight is None:
        edge_weight = jnp.ones((edge_index.shape[1],), jnp.float32)
    a = jnp.zeros((num_nodes, num_nodes), jnp.float32)
    # GCNConv message flow: aggregate x[src] into dst  =>  A[dst, src] += w.
    a = a.at[edge_index[1], edge_index[0]].add(edge_weight.astype(jnp.float32))
    a = a + jnp.eye(num_nodes, dtype=jnp.float32)        # self loops
    deg = jnp.sum(a, axis=1)
    d = jnp.where(deg > 0, jax.lax.rsqrt(deg), 0.0)
    return d[:, None] * a * d[None, :]


def init_gbt_params(key, input_dim, hidden, output_dim, layer_num):
    params = {"layers": []}
    dims = [input_dim] + [hidden] * layer_num
    for l in range(layer_num):
        key, kw, kb, kg, ke = jax.random.split(key, 5)
        fan_in, fan_out = dims[l], dims[l + 1]
        w = jax.random.normal(kw, (fan_in, fan_out), jnp.float32) * (fan_in ** -0.5)
        b = jax.random.uniform(kb, (1, fan_out), jnp.float32, -0.1, 0.1)
        gamma = 1.0 + jax.random.uniform(kg, (1, fan_out), jnp.float32, -0.1, 0.1)
        beta = jax.random.uniform(ke, (1, fan_out), jnp.float32, -0.1, 0.1)
        params["layers"].append((w, b, gamma, beta))
    key, kc, kcb = jax.random.split(key, 3)
    wc = jax.random.normal(kc, (hidden, output_dim), jnp.float32) * (hidden ** -0.5)
    bc = jax.random.uniform(kcb, (1, output_dim), jnp.float32, -0.1, 0.1)
    params["classifier"] = (wc, bc)
    return params


def gbt_forward(params, x, edge_index, edge_weight=None,
                last_activation=False, path="auto"):
    """Equivalent of GBT.forward(x, edge_index, edge_weight): encoder + classifier."""
    n, f_in = x.shape
    n_pad = _round_up(n, _LANE)

    a_hat = _pad2(_dense_norm_adj(edge_index, edge_weight, n),
                  n_pad, n_pad).astype(jnp.bfloat16)
    x_p = _pad2(x, n_pad, _round_up(f_in, _LANE)).astype(jnp.bfloat16)

    layers = []
    for (w, b, g, be) in params["layers"]:
        fi, fo = w.shape
        fi_p, fo_p = _round_up(fi, _LANE), _round_up(fo, _LANE)
        layers.append((_pad2(w, fi_p, fo_p).astype(jnp.bfloat16),
                       _pad2(b, 1, fo_p),
                       _pad2(g, 1, fo_p, value=1.0),
                       _pad2(be, 1, fo_p)))
    wc, bc = params["classifier"]
    hc, oc = wc.shape
    hc_p, oc_p = _round_up(hc, _LANE), _round_up(oc, _LANE)
    wc_p = _pad2(wc, hc_p, oc_p).astype(jnp.bfloat16)
    bc_p = _pad2(bc, 1, oc_p)

    if path == "auto":
        path = "fused" if n_pad <= _FUSED_MAX_NODES else "tiled"
    if path == "fused":
        out_p = _fused_forward(a_hat, x_p, layers, wc_p, bc_p,
                               n_valid=n, last_activation=last_activation)
    else:
        out_p = _tiled_forward(a_hat, x_p, layers, wc_p, bc_p,
                               n_valid=n, last_activation=last_activation)
    return out_p[:n, :oc]


def _reference_forward(params, x, edge_index, edge_weight=None, last_activation=False):
    """Plain-JAX reference with the same bf16-operand / f32-accumulate policy."""
    a = _dense_norm_adj(edge_index, edge_weight, x.shape[0]).astype(jnp.bfloat16)
    h = x.astype(jnp.bfloat16)
    num_layers = len(params["layers"])
    for l, (w, b, g, be) in enumerate(params["layers"]):
        xw = jnp.dot(h, w.astype(jnp.bfloat16), preferred_element_type=jnp.float32)
        hp = jnp.dot(a, xw.astype(jnp.bfloat16), preferred_element_type=jnp.float32) + b
        if (l < num_layers - 1) or last_activation:
            mean = jnp.mean(hp, axis=0, keepdims=True)
            var = jnp.mean((hp - mean) ** 2, axis=0, keepdims=True)
            hp = (hp - mean) * jax.lax.rsqrt(var + _EPS) * g + be
            hp = jnp.maximum(hp, 0.0)
        h = hp.astype(jnp.bfloat16)
    wc, bc = params["classifier"]
    return jnp.dot(h, wc.astype(jnp.bfloat16), preferred_element_type=jnp.float32) + bc


# ----------------------------------------------------------------------------
if __name__ == "__main__":
    key = jax.random.PRNGKey(0)

    # ---- small graph: exercise the fused single-kernel path and the tiled path
    num_nodes, input_dim, hidden, output_dim, layer_num, num_edges = 32, 16, 32, 8, 2, 64
    key, kx, ke, kw, kp = jax.random.split(key, 5)
    x = jax.random.normal(kx, (num_nodes, input_dim), jnp.float32)
    src = jax.random.randint(ke, (num_edges,), 0, num_nodes)
    dst = jax.random.randint(jax.random.fold_in(ke, 1), (num_edges,), 0, num_nodes)
    edge_index = jnp.stack([src, dst], axis=0)
    edge_weight = jax.random.uniform(kw, (num_edges,), jnp.float32, 0.5, 1.5)
    params = init_gbt_params(kp, input_dim, hidden, output_dim, layer_num)

    out_fused = gbt_forward(params, x, edge_index, edge_weight, path="fused")
    out_tiled = gbt_forward(params, x, edge_index, edge_weight, path="tiled")
    ref = _reference_forward(params, x, edge_index, edge_weight)
    jax.block_until_ready((out_fused, out_tiled, ref))

    assert out_fused.shape == (num_nodes, output_dim)
    assert out_tiled.shape == (num_nodes, output_dim)
    assert bool(jnp.all(jnp.isfinite(out_fused)))
    assert bool(jnp.all(jnp.isfinite(out_tiled)))
    assert bool(jnp.allclose(out_fused, ref, rtol=5e-2, atol=5e-2))
    assert bool(jnp.allclose(out_tiled, ref, rtol=5e-2, atol=5e-2))
    assert bool(jnp.allclose(out_fused, out_tiled, rtol=5e-2, atol=5e-2))

    # ---- larger graph: exercise the multi-tile grid path
    #      (N=300 -> N_pad=384 -> 3 node tiles; hidden=200 -> 256 -> 2 feature tiles)
    n2, f2, h2, o2, e2 = 300, 48, 200, 16, 1500
    key, kx2, ke2, kw2, kp2 = jax.random.split(key, 5)
    x2 = jax.random.normal(kx2, (n2, f2), jnp.float32)
    src2 = jax.random.randint(ke2, (e2,), 0, n2)
    dst2 = jax.random.randint(jax.random.fold_in(ke2, 1), (e2,), 0, n2)
    ei2 = jnp.stack([src2, dst2], axis=0)
    ew2 = jax.random.uniform(kw2, (e2,), jnp.float32, 0.5, 1.5)
    params2 = init_gbt_params(kp2, f2, h2, o2, layer_num)

    out2 = gbt_forward(params2, x2, ei2, ew2, path="tiled")
    ref2 = _reference_forward(params2, x2, ei2, ew2)
    out2 = jax.block_until_ready(out2)
    assert out2.shape == (n2, o2)
    assert bool(jnp.all(jnp.isfinite(out2)))
    assert bool(jnp.allclose(out2, ref2, rtol=5e-2, atol=5e-2))

    print("KERNEL_OK")
</pallas_src>

<mosaic_0001>
module attributes {stable_mosaic.version = 11 : i64} {
  func.func @kernel(%arg0: memref<128x128xbf16, #tpu.memory_space<vmem>>, %arg1: memref<128x128xbf16, #tpu.memory_space<vmem>>, %arg2: memref<128x128xbf16, #tpu.memory_space<vmem>>, %arg3: memref<1x128xf32, #tpu.memory_space<vmem>>, %arg4: memref<1x128xf32, #tpu.memory_space<vmem>>, %arg5: memref<1x128xf32, #tpu.memory_space<vmem>>, %arg6: memref<128x128xbf16, #tpu.memory_space<vmem>>, %arg7: memref<1x128xf32, #tpu.memory_space<vmem>>, %arg8: memref<1x128xf32, #tpu.memory_space<vmem>>, %arg9: memref<1x128xf32, #tpu.memory_space<vmem>>, %arg10: memref<128x128xbf16, #tpu.memory_space<vmem>>, %arg11: memref<1x128xf32, #tpu.memory_space<vmem>>, %arg12: memref<128x128xf32, #tpu.memory_space<vmem>>) attributes {dimension_semantics = [], scalar_prefetch = 0 : i64, scratch_operands = 0 : i64, tpu.core_type = #tpu.core_type<tc>} {
    %c0 = arith.constant 0 : index
    %c0_0 = arith.constant 0 : index
    %0 = vector.load %arg0[%c0, %c0_0] : memref<128x128xbf16, #tpu.memory_space<vmem>>, vector<128x128xbf16>
    %c0_1 = arith.constant 0 : index
    %c0_2 = arith.constant 0 : index
    %1 = vector.load %arg1[%c0_1, %c0_2] : memref<128x128xbf16, #tpu.memory_space<vmem>>, vector<128x128xbf16>
    %c0_3 = arith.constant 0 : index
    %c0_4 = arith.constant 0 : index
    %2 = vector.load %arg2[%c0_3, %c0_4] : memref<128x128xbf16, #tpu.memory_space<vmem>>, vector<128x128xbf16>
    %cst = arith.constant dense<0.000000e+00> : vector<128x128xf32>
    %3 = tpu.matmul %1, %2, %cst {dimension_numbers = #tpu.dot_dimension_numbers<[1], [0], [0], [1], [0, 0, 1, 1], [], []>} : vector<128x128xbf16>, vector<128x128xbf16>, vector<128x128xf32> -> vector<128x128xf32>
    %4 = arith.truncf %3 : vector<128x128xf32> to vector<128x128xbf16>
    %cst_5 = arith.constant dense<0.000000e+00> : vector<128x128xf32>
    %5 = tpu.matmul %0, %4, %cst_5 {dimension_numbers = #tpu.dot_dimension_numbers<[1], [0], [0], [1], [0, 0, 1, 1], [], []>} : vector<128x128xbf16>, vector<128x128xbf16>, vector<128x128xf32> -> vector<128x128xf32>
    %c0_6 = arith.constant 0 : index
    %c0_7 = arith.constant 0 : index
    %6 = vector.load %arg3[%c0_6, %c0_7] : memref<1x128xf32, #tpu.memory_space<vmem>>, vector<1x128xf32>
    %7 = vector.broadcast %6 : vector<1x128xf32> to vector<128x128xf32>
    %8 = arith.addf %5, %7 : vector<128x128xf32>
    %9 = tpu.iota {dimensions = array<i32: 0>} : vector<128x128xi32>
    %c32_i32 = arith.constant 32 : i32
    %10 = vector.broadcast %c32_i32 : i32 to vector<128x128xi32>
    %11 = arith.cmpi slt, %9, %10 : vector<128x128xi32>
    %cst_8 = arith.constant 0.000000e+00 : f32
    %12 = vector.broadcast %cst_8 : f32 to vector<128x128xf32>
    %13 = arith.select %11, %8, %12 : vector<128x128xi1>, vector<128x128xf32>
    %cst_9 = arith.constant dense<0.000000e+00> : vector<128xf32>
    %14 = vector.multi_reduction <add>, %13, %cst_9 [0] : vector<128x128xf32> to vector<128xf32>
    %15 = vector.shape_cast %14 : vector<128xf32> to vector<1x128xf32>
    %16 = arith.mulf %13, %13 : vector<128x128xf32>
    %cst_10 = arith.constant dense<0.000000e+00> : vector<128xf32>
    %17 = vector.multi_reduction <add>, %16, %cst_10 [0] : vector<128x128xf32> to vector<128xf32>
    %18 = vector.shape_cast %17 : vector<128xf32> to vector<1x128xf32>
    %cst_11 = arith.constant 3.125000e-02 : f32
    %19 = vector.broadcast %cst_11 : f32 to vector<1x128xf32>
    %20 = arith.mulf %15, %19 : vector<1x128xf32>
    %cst_12 = arith.constant 3.125000e-02 : f32
    %21 = vector.broadcast %cst_12 : f32 to vector<1x128xf32>
    %22 = arith.mulf %18, %21 : vector<1x128xf32>
    %23 = arith.mulf %20, %20 : vector<1x128xf32>
    %24 = arith.subf %22, %23 : vector<1x128xf32>
    %cst_13 = arith.constant 0.000000e+00 : f32
    %25 = vector.broadcast %cst_13 : f32 to vector<1x128xf32>
    %26 = arith.maximumf %24, %25 : vector<1x128xf32>
    %27 = vector.broadcast %20 : vector<1x128xf32> to vector<128x128xf32>
    %28 = arith.subf %8, %27 : vector<128x128xf32>
    %cst_14 = arith.constant 9.99999974E-6 : f32
    %29 = vector.broadcast %cst_14 : f32 to vector<1x128xf32>
    %30 = arith.addf %26, %29 : vector<1x128xf32>
    %31 = math.rsqrt %30 : vector<1x128xf32>
    %32 = vector.broadcast %31 : vector<1x128xf32> to vector<128x128xf32>
    %33 = arith.mulf %28, %32 : vector<128x128xf32>
    %c0_15 = arith.constant 0 : index
    %c0_16 = arith.constant 0 : index
    %34 = vector.load %arg4[%c0_15, %c0_16] : memref<1x128xf32, #tpu.memory_space<vmem>>, vector<1x128xf32>
    %35 = vector.broadcast %34 : vector<1x128xf32> to vector<128x128xf32>
    %36 = arith.mulf %33, %35 : vector<128x128xf32>
    %c0_17 = arith.constant 0 : index
    %c0_18 = arith.constant 0 : index
    %37 = vector.load %arg5[%c0_17, %c0_18] : memref<1x128xf32, #tpu.memory_space<vmem>>, vector<1x128xf32>
    %38 = vector.broadcast %37 : vector<1x128xf32> to vector<128x128xf32>
    %39 = arith.addf %36, %38 : vector<128x128xf32>
    %cst_19 = arith.constant 0.000000e+00 : f32
    %40 = vector.broadcast %cst_19 : f32 to vector<128x128xf32>
    %41 = arith.maximumf %39, %40 : vector<128x128xf32>
    %42 = arith.truncf %41 : vector<128x128xf32> to vector<128x128xbf16>
    %c0_20 = arith.constant 0 : index
    %c0_21 = arith.constant 0 : index
    %43 = vector.load %arg6[%c0_20, %c0_21] : memref<128x128xbf16, #tpu.memory_space<vmem>>, vector<128x128xbf16>
    %cst_22 = arith.constant dense<0.000000e+00> : vector<128x128xf32>
    %44 = tpu.matmul %42, %43, %cst_22 {dimension_numbers = #tpu.dot_dimension_numbers<[1], [0], [0], [1], [0, 0, 1, 1], [], []>} : vector<128x128xbf16>, vector<128x128xbf16>, vector<128x128xf32> -> vector<128x128xf32>
    %45 = arith.truncf %44 : vector<128x128xf32> to vector<128x128xbf16>
    %cst_23 = arith.constant dense<0.000000e+00> : vector<128x128xf32>
    %46 = tpu.matmul %0, %45, %cst_23 {dimension_numbers = #tpu.dot_dimension_numbers<[1], [0], [0], [1], [0, 0, 1, 1], [], []>} : vector<128x128xbf16>, vector<128x128xbf16>, vector<128x128xf32> -> vector<128x128xf32>
    %c0_24 = arith.constant 0 : index
    %c0_25 = arith.constant 0 : index
    %47 = vector.load %arg7[%c0_24, %c0_25] : memref<1x128xf32, #tpu.memory_space<vmem>>, vector<1x128xf32>
    %48 = vector.broadcast %47 : vector<1x128xf32> to vector<128x128xf32>
    %49 = arith.addf %46, %48 : vector<128x128xf32>
    %50 = arith.truncf %49 : vector<128x128xf32> to vector<128x128xbf16>
    %c0_26 = arith.constant 0 : index
    %c0_27 = arith.constant 0 : index
    %51 = vector.load %arg10[%c0_26, %c0_27] : memref<128x128xbf16, #tpu.memory_space<vmem>>, vector<128x128xbf16>
    %cst_28 = arith.constant dense<0.000000e+00> : vector<128x128xf32>
    %52 = tpu.matmul %50, %51, %cst_28 {dimension_numbers = #tpu.dot_dimension_numbers<[1], [0], [0], [1], [0, 0, 1, 1], [], []>} : vector<128x128xbf16>, vector<128x128xbf16>, vector<128x128xf32> -> vector<128x128xf32>
    %c0_29 = arith.constant 0 : index
    %c0_30 = arith.constant 0 : index
    %53 = vector.load %arg11[%c0_29, %c0_30] : memref<1x128xf32, #tpu.memory_space<vmem>>, vector<1x128xf32>
    %54 = vector.broadcast %53 : vector<1x128xf32> to vector<128x128xf32>
    %55 = arith.addf %52, %54 : vector<128x128xf32>
    %c0_31 = arith.constant 0 : index
    %c0_32 = arith.constant 0 : index
    %56 = vector.load %arg12[%c0_31, %c0_32] : memref<128x128xf32, #tpu.memory_space<vmem>>, vector<128x128xf32>
    tpu.vector_store %arg12[%c0_31, %c0_32], %55 {strides = array<i32>} : memref<128x128xf32, #tpu.memory_space<vmem>>, vector<128x128xf32>,
    return
  }
}

</mosaic_0001>

<bundles_post_ra>
// kernel: tpu_custom_call.1
= control target key start
LH: loop header
LB: loop body
LE: loop exit
PB: predicated region body
PF: predicated region fallthrough
CT: control target
= control target key end

     0   :  { %17 = vsyncpa [#allocation3], 0  ;;  %s1986_s0 = inlined_call_operand.hbm [shape: bf16[128,128], index: 0, kind: input, shape index: {}]   ;;  %s1987_s1 = inlined_call_operand.hbm [shape: bf16[128,128], index: 1, kind: input, shape index: {}]   ;;  %s1988_s2 = inlined_call_operand.hbm [shape: bf16[128,128], index: 2, kind: input, shape index: {}]   ;;  %s1989_s3 = inlined_call_operand.vmem [shape: f32[1,128], index: 3, kind: input, shape index: {}]   ;;  %s1990_s4 = inlined_call_operand.vmem [shape: f32[1,128], index: 4, kind: input, shape index: {}]   ;;  %s1991_s5 = inlined_call_operand.vmem [shape: f32[1,128], index: 5, kind: input, shape index: {}]   ;;  %s1992_s6 = inlined_call_operand.hbm [shape: bf16[128,128], index: 6, kind: input, shape index: {}]   ;;  %s1993_s7 = inlined_call_operand.vmem [shape: f32[1,128], index: 7, kind: input, shape index: {}]   ;;  %s1994_s8 = inlined_call_operand.vmem [shape: f32[1,128], index: 8, kind: input, shape index: {}]   ;;  %s1995_s9 = inlined_call_operand.vmem [shape: f32[1,128], index: 9, kind: input, shape index: {}]   ;;  %s1996_s10 = inlined_call_operand.hbm [shape: bf16[128,128], index: 10, kind: input, shape index: {}]   ;;  %s1997_s11 = inlined_call_operand.vmem [shape: f32[1,128], index: 11, kind: input, shape index: {}]   ;;  %s1998_s12 = inlined_call_operand.hbm [shape: f32[128,128], index: 12, kind: output, shape index: {}]  }
   0x1   :  { %18 = vsyncpa [#allocation6], 0 }
   0x2   :  { %19 = vsyncpa [#allocation9], 0 }
   0x3   :  { %20 = vsyncpa [#allocation4], 0  ;;  %s1705_s21 = smov [#allocation5]   ;;  %s1706_s23 = smov [#allocation8]  }
   0x4   :  { %s38_s22 = sshll.u32 %s1705_s21, 4  ;;  %s68_s8 = sshll.u32 %s1706_s23, 4  ;;  %s39_s22 = int_to_ptr.vmem [resolvable:$true] %s38_s22  ;;  %s1780_s8 = int_to_ptr.vmem [resolvable:$true] %s68_s8 }
   0x5   :  { %s1565_s25 = scalar_lea.hbm %s1987_s1, 1024 }
   0x6   :  { %p1566_p0 = scmp.ne.s32.totalorder %s1987_s1, %s1565_s25  ;;  %p1569_p1 = scmp.lt.u32.totalorder %s1565_s25, %s1987_s1 }
   0x8   :  { %p1571_p2 = pnand %p1569_p1, %p1566_p0 }
   0xa   :  { %1574 = shalt.err (!%p1571_p2)
}
   0xb   :  { %s1575_s30 = scalar_lea.vmem %s39_s22, 1024  ;;  %p1580_p4 = scmp.lt.s32.totalorder %s39_s22, %s39_s22 }
   0xc   :  { %p1576_p3 = scmp.ne.s32.totalorder %s39_s22, %s1575_s30  ;;  %p1581_p5 = scmp.lt.s32.totalorder %s1575_s30, %s1575_s30 }
   0xe   :  { %p1582_p6 = por %p1581_p5, %p1580_p4 }
  0x10   :  { %p1583_p7 = pnand %p1582_p6, %p1576_p3 }
  0x12   :  { %1586 = shalt.err (!%p1583_p7)
}
  0x13   :  { %s1707_s13 = smov 64   ;;  %s1708_s14 = smov 4  }
  0x14   :  { %44 = dma.hbm_to_vmem [thread:$0]  %s1987_s1, 1024, %s39_s22, [#allocation6], %s1707_s13, %s1707_s13, %s1708_s14  }
  0x15   :  { %s1587_s19 = scalar_lea.hbm %s1992_s6, 1024 }
  0x16   :  { %p1588_p8 = scmp.ne.s32.totalorder %s1992_s6, %s1587_s19  ;;  %p1591_p9 = scmp.lt.u32.totalorder %s1587_s19, %s1992_s6 }
  0x18   :  { %p1593_p10 = pnand %p1591_p9, %p1588_p8 }
  0x1a   :  { %1596 = shalt.err (!%p1593_p10)
}
  0x1b   :  { %s1597_s24 = scalar_lea.vmem %s1780_s8, 1024  ;;  %p1602_p12 = scmp.lt.s32.totalorder %s1780_s8, %s1780_s8 }
  0x1c   :  { %p1598_p11 = scmp.ne.s32.totalorder %s1780_s8, %s1597_s24  ;;  %p1603_p13 = scmp.lt.s32.totalorder %s1597_s24, %s1597_s24 }
  0x1e   :  { %p1604_p0 = por %p1603_p13, %p1602_p12 }
  0x20   :  { %p1605_p1 = pnand %p1604_p0, %p1598_p11 }
  0x22   :  { %1608 = shalt.err (!%p1605_p1)
}
  0x23   :  { %74 = dma.hbm_to_vmem [thread:$0]  %s1992_s6, 1024, %s1780_s8, [#allocation9], %s1707_s13, %s1707_s13, %s1708_s14  }
  0x24   :  { %s1709_s25 = smov [#allocation2]   ;;  %s1710_s27 = smov [#allocation7]  }
  0x25   :  { %s26_s26 = sshll.u32 %s1709_s25, 4  ;;  %s50_s28 = sshll.u32 %s1710_s27, 4  ;;  %s27_s26 = int_to_ptr.vmem [resolvable:$true] %s26_s26  ;;  %s1817_s28 = int_to_ptr.vmem [resolvable:$true] %s50_s28 }
  0x26   :  { %s1609_s15 = scalar_lea.hbm %s1986_s0, 1024 }
  0x27   :  { %p1610_p2 = scmp.ne.s32.totalorder %s1986_s0, %s1609_s15  ;;  %p1613_p3 = scmp.lt.u32.totalorder %s1609_s15, %s1986_s0 }
  0x29   :  { %p1615_p4 = pnand %p1613_p3, %p1610_p2 }
  0x2b   :  { %1618 = shalt.err (!%p1615_p4)
}
  0x2c   :  { %s1619_s6 = scalar_lea.vmem %s27_s26, 1024  ;;  %p1624_p6 = scmp.lt.s32.totalorder %s27_s26, %s27_s26 }
  0x2d   :  { %p1620_p5 = scmp.ne.s32.totalorder %s27_s26, %s1619_s6  ;;  %p1625_p7 = scmp.lt.s32.totalorder %s1619_s6, %s1619_s6 }
  0x2f   :  { %p1626_p8 = por %p1625_p7, %p1624_p6 }
  0x31   :  { %p1627_p9 = pnand %p1626_p8, %p1620_p5 }
  0x33   :  { %1630 = shalt.err (!%p1627_p9)
}
  0x34   :  { %32 = dma.hbm_to_vmem [thread:$0]  %s1986_s0, 1024, %s27_s26, [#allocation3], %s1707_s13, %s1707_s13, %s1708_s14  }
  0x35   :  { %s1631_s9 = scalar_lea.hbm %s1988_s2, 1024 }
  0x36   :  { %p1632_p10 = scmp.ne.s32.totalorder %s1988_s2, %s1631_s9  ;;  %p1635_p11 = scmp.lt.u32.totalorder %s1631_s9, %s1988_s2 }
  0x38   :  { %p1637_p12 = pnand %p1635_p11, %p1632_p10 }
  0x3a   :  { %1640 = shalt.err (!%p1637_p12)
}
  0x3b   :  { %s1641_s27 = scalar_lea.vmem %s1817_s28, 1024  ;;  %p1646_p0 = scmp.lt.s32.totalorder %s1817_s28, %s1817_s28 }
  0x3c   :  { %p1642_p13 = scmp.ne.s32.totalorder %s1817_s28, %s1641_s27  ;;  %p1647_p1 = scmp.lt.s32.totalorder %s1641_s27, %s1641_s27 }
  0x3e   :  { %p1648_p2 = por %p1647_p1, %p1646_p0 }
  0x40   :  { %p1649_p3 = pnand %p1648_p2, %p1642_p13 }
  0x42   :  { %1652 = shalt.err (!%p1649_p3)
}
  0x43   :  { %56 = dma.hbm_to_vmem [thread:$0]  %s1988_s2, 1024, %s1817_s28, [#allocation6], %s1707_s13, %s1707_s13, %s1708_s14  }
  0x44   :  { %s1711_s29 = smov [#allocation10]   ;;  %s1653_s17 = scalar_lea.hbm %s1996_s10, 1024 }
  0x45   :  { %s86_s30 = sshll.u32 %s1711_s29, 4  ;;  %p1654_p4 = scmp.ne.s32.totalorder %s1996_s10, %s1653_s17  ;;  %s87_s30 = int_to_ptr.vmem [resolvable:$true] %s86_s30 }
  0x46   :  { %p1657_p5 = scmp.lt.u32.totalorder %s1653_s17, %s1996_s10 }
  0x48   :  { %p1659_p6 = pnand %p1657_p5, %p1654_p4 }
  0x4a   :  { %1662 = shalt.err (!%p1659_p6)
}
  0x4b   :  { %s1663_s20 = scalar_lea.vmem %s87_s30, 1024  ;;  %p1668_p8 = scmp.lt.s32.totalorder %s87_s30, %s87_s30 }
  0x4c   :  { %p1664_p7 = scmp.ne.s32.totalorder %s87_s30, %s1663_s20  ;;  %p1669_p9 = scmp.lt.s32.totalorder %s1663_s20, %s1663_s20 }
  0x4e   :  { %p1670_p10 = por %p1669_p9, %p1668_p8 }
  0x50   :  { %p1671_p11 = pnand %p1670_p10, %p1664_p7 }
  0x52   :  { %1674 = shalt.err (!%p1671_p11)
}
  0x53   :  { %92 = dma.hbm_to_vmem [thread:$0]  %s1996_s10, 1024, %s87_s30, [#allocation9], %s1707_s13, %s1707_s13, %s1708_s14  }
  0x54   :  { %1697 = dma.done.wait [#allocation3], 1024  }
  0x55   :  { %1698 = vsyncadd [#allocation3], 4294966272 }
  0x56   :  { %1699 = dma.done.wait [#allocation6], 2048  }
  0x57   :  { %1700 = vsyncadd [#allocation6], 4294965248 }
  0x58   :  { %1701 = dma.done.wait [#allocation9], 2048  }
  0x59   :  { %1702 = vsyncadd [#allocation9], 4294965248  ;;  %v1523_v0 = vld [vmem:[#allocation7] sm:$0xff]   ;;  %v1524_v1 = vld [vmem:[#allocation7 + $0x8] sm:$0xff]  }
  0x5a   :  { %1337 = vmatprep.subr.bf16.mxu0 %v1523_v0  ;;  %v1525_v2 = vld [vmem:[#allocation7 + $0x10] sm:$0xff]   ;;  %v1526_v3 = vld [vmem:[#allocation7 + $0x18] sm:$0xff]   ;;  %v1531_v4 = vld [vmem:[#allocation5] sm:$0xff]  }
  0x5b   :  { %1338 = vmatpush3.bf16.msra.mxu0 %v1523_v0  ;;  %1353 = vmatprep.mubr.bf16.mxu0 %v1531_v4  ;;  %v1527_v5 = vld [vmem:[#allocation7 + $0x20] sm:$0xff]   ;;  %v1528_v6 = vld [vmem:[#allocation7 + $0x28] sm:$0xff]   ;;  %v1529_v7 = vld [vmem:[#allocation7 + $0x30] sm:$0xff]  }
  0x5c   :  { %1339 = vmatprep.subr.bf16.mxu0 %v1524_v1  ;;  %v1530_v8 = vld [vmem:[#allocation7 + $0x38] sm:$0xff]   ;;  %v1532_v9 = vld [vmem:[#allocation5 + $0x8] sm:$0xff]   ;;  %v1533_v10 = vld [vmem:[#allocation5 + $0x10] sm:$0xff]  }
  0x5d   :  { %v1534_v11 = vld [vmem:[#allocation5 + $0x18] sm:$0xff]   ;;  %v1535_v12 = vld [vmem:[#allocation5 + $0x20] sm:$0xff]   ;;  %v1536_v13 = vld [vmem:[#allocation5 + $0x28] sm:$0xff]  }
  0x5e   :  { %v1537_v14 = vld [vmem:[#allocation5 + $0x30] sm:$0xff]   ;;  %v1538_v15 = vld [vmem:[#allocation5 + $0x38] sm:$0xff]   ;;  %v1539_v16 = vld [vmem:[#allocation2] sm:$0xff]  }
  0x5f   :  { %1340 = vmatpush3.bf16.msra.mxu0 %v1524_v1  ;;  %1385 = vmatprep.mubr.bf16.mxu1 %v1539_v16  ;;  %v1869_v41 = vld [vmem:[#allocation2 + $0x8] sm:$0xff]   ;;  %v1871_v42 = vld [vmem:[#allocation2 + $0x10] sm:$0xff]   ;;  %v1875_v43 = vld [vmem:[#allocation2 + $0x18] sm:$0xff]  }
  0x60   :  { %1341 = vmatprep.subr.bf16.mxu0 %v1525_v2  ;;  %v1877_v44 = vld [vmem:[#allocation2 + $0x20] sm:$0xff]   ;;  %v1881_v45 = vld [vmem:[#allocation2 + $0x28] sm:$0xff]   ;;  %v1883_v46 = vld [vmem:[#allocation2 + $0x30] sm:$0xff]  }
  0x61   :  { %v1887_v47 = vld [vmem:[#allocation2 + $0x38] sm:$0xff]   ;;  %v1547_v48 = vld [vmem:[#allocation8] sm:$0xff]   ;;  %v1548_v49 = vld [vmem:[#allocation8 + $0x8] sm:$0xff]  }
  0x62   :  { %v1549_v50 = vld [vmem:[#allocation8 + $0x10] sm:$0xff]   ;;  %v1550_v51 = vld [vmem:[#allocation8 + $0x18] sm:$0xff]   ;;  %v1551_v52 = vld [vmem:[#allocation8 + $0x20] sm:$0xff]  }
  0x63   :  { %1342 = vmatpush3.bf16.msra.mxu0 %v1525_v2  ;;  %v1552_v53 = vld [vmem:[#allocation8 + $0x28] sm:$0xff]   ;;  %v1553_v54 = vld [vmem:[#allocation8 + $0x30] sm:$0xff]   ;;  %v1554_v55 = vld [vmem:[#allocation8 + $0x38] sm:$0xff]  }
  0x64   :  { %1343 = vmatprep.subr.bf16.mxu0 %v1526_v3  ;;  %v1893_v56 = vld [vmem:[%s1989_s3] ss:$0 sm:$0xff] }
  0x67   :  { %1344 = vmatpush3.bf16.msra.mxu0 %v1526_v3 }
  0x68   :  { %1345 = vmatprep.subr.bf16.mxu0 %v1527_v5 }
  0x6b   :  { %1346 = vmatpush3.bf16.msra.mxu0 %v1527_v5 }
  0x6c   :  { %1347 = vmatprep.subr.bf16.mxu0 %v1528_v6 }
  0x6f   :  { %1348 = vmatpush3.bf16.msra.mxu0 %v1528_v6 }
  0x70   :  { %1349 = vmatprep.subr.bf16.mxu0 %v1529_v7 }
  0x73   :  { %1350 = vmatpush3.bf16.msra.mxu0 %v1529_v7 }
  0x74   :  { %1351 = vmatprep.subr.bf16.mxu0 %v1530_v8 }
  0x77   :  { %1352 = vmatpush3.bf16.msra.mxu0 %v1530_v8 }
  0x78   :  { %1401 = vmatprep.subr.bf16.mxu0 %v1547_v48 }
  0x7a   :  { %1354 = vmatmul.mubr.bf16.vlgmr.msra.gmra.mrb[0].mxu0 %v1532_v9 }
  0x7b   :  { %1357 = vmatprep.mubr.bf16.mxu0 %v1533_v10  ;;  %1402 = vmatpush3.bf16.msra.mxu0 %v1547_v48 }
  0x7c   :  { %1403 = vmatprep.subr.bf16.mxu0 %v1548_v49 }
  0x7f   :  { %1404 = vmatpush3.bf16.msra.mxu0 %v1548_v49 }
  0x80   :  { %1405 = vmatprep.subr.bf16.mxu0 %v1549_v50 }
  0x82   :  { %1358 = vmatmul.mubr.bf16.gmra.mrb[4].mxu0 %v1534_v11 }
  0x83   :  { %1361 = vmatprep.mubr.bf16.mxu0 %v1535_v12  ;;  %1406 = vmatpush3.bf16.msra.mxu0 %v1549_v50 }
  0x84   :  { %1407 = vmatprep.subr.bf16.mxu0 %v1550_v51 }
  0x87   :  { %1408 = vmatpush3.bf16.msra.mxu0 %v1550_v51 }
  0x88   :  { %1409 = vmatprep.subr.bf16.mxu0 %v1551_v52 }
  0x8a   :  { %1362 = vmatmul.mubr.bf16.gmra.mrb[8].mxu0 %v1536_v13 }
  0x8b   :  { %1365 = vmatprep.mubr.bf16.mxu0 %v1537_v14  ;;  %1410 = vmatpush3.bf16.msra.mxu0 %v1551_v52 }
  0x8c   :  { %1411 = vmatprep.subr.bf16.mxu0 %v1552_v53 }
  0x8f   :  { %1412 = vmatpush3.bf16.msra.mxu0 %v1552_v53 }
  0x90   :  { %1413 = vmatprep.subr.bf16.mxu0 %v1553_v54 }
  0x92   :  { %1366 = vmatmul.mubr.bf16.gmra.mrb[12].mxu0 %v1538_v15 }
  0x93   :  { %1414 = vmatpush3.bf16.msra.mxu0 %v1553_v54 }
  0x94   :  { %1415 = vmatprep.subr.bf16.mxu0 %v1554_v55 }
  0x97   :  { %1416 = vmatpush3.bf16.msra.mxu0 %v1554_v55 }
 0x14d   :  { %v1355_v17 = vpop.f32.mrb[0].mxu0 }
 0x14e   :  { %v289_v18 = vpop.f32.mrb[1].mxu0 }
 0x14f   :  { %v1356_v19 = vpop.f32.mrb[2].mxu0 }
 0x150   :  { %v353_v20 = vpack.c.bf16 %v1356_v19, %v1355_v17  ;;  %v292_v21 = vpop.f32.mrb[3].mxu0 }
 0x151   :  { %v352_v22 = vpack.c.bf16 %v292_v21, %v289_v18 }
 0x153   :  { %1369 = vmatprep.subr.bf16.mxu1 %v352_v22 }
 0x154   :  { %1370 = vmatpush3.bf16.msra.mxu1 %v352_v22 }
 0x155   :  { %v1359_v23 = vpop.f32.mrb[4].mxu0  ;;  %1371 = vmatprep.subr.bf16.mxu1 %v353_v20 }
 0x156   :  { %v305_v24 = vpop.f32.mrb[5].mxu0 }
 0x157   :  { %v1360_v25 = vpop.f32.mrb[6].mxu0 }
 0x158   :  { %v355_v26 = vpack.c.bf16 %v1360_v25, %v1359_v23  ;;  %v308_v27 = vpop.f32.mrb[7].mxu0  ;;  %1372 = vmatpush3.bf16.msra.mxu1 %v353_v20 }
 0x159   :  { %v354_v28 = vpack.c.bf16 %v308_v27, %v305_v24 }
 0x15b   :  { %1373 = vmatprep.subr.bf16.mxu1 %v354_v28 }
 0x15c   :  { %1374 = vmatpush3.bf16.msra.mxu1 %v354_v28 }
 0x15d   :  { %v1363_v29 = vpop.f32.mrb[8].mxu0  ;;  %1375 = vmatprep.subr.bf16.mxu1 %v355_v26 }
 0x15e   :  { %v321_v30 = vpop.f32.mrb[9].mxu0 }
 0x15f   :  { %v1364_v31 = vpop.f32.mrb[10].mxu0 }
 0x160   :  { %v357_v32 = vpack.c.bf16 %v1364_v31, %v1363_v29  ;;  %v324_v33 = vpop.f32.mrb[11].mxu0  ;;  %1376 = vmatpush3.bf16.msra.mxu1 %v355_v26 }
 0x161   :  { %v356_v34 = vpack.c.bf16 %v324_v33, %v321_v30 }
 0x163   :  { %1377 = vmatprep.subr.bf16.mxu1 %v356_v34 }
 0x164   :  { %1378 = vmatpush3.bf16.msra.mxu1 %v356_v34 }
 0x165   :  { %v1367_v35 = vpop.f32.mrb[12].mxu0  ;;  %1379 = vmatprep.subr.bf16.mxu1 %v357_v32 }
 0x166   :  { %v337_v36 = vpop.f32.mrb[13].mxu0 }
 0x167   :  { %v1368_v37 = vpop.f32.mrb[14].mxu0 }
 0x168   :  { %v359_v38 = vpack.c.bf16 %v1368_v37, %v1367_v35  ;;  %v340_v39 = vpop.f32.mrb[15].mxu0  ;;  %1380 = vmatpush3.bf16.msra.mxu1 %v357_v32 }
 0x169   :  { %v358_v40 = vpack.c.bf16 %v340_v39, %v337_v36 }
 0x16b   :  { %1381 = vmatprep.subr.bf16.mxu1 %v358_v40 }
 0x16c   :  { %1382 = vmatpush3.bf16.msra.mxu1 %v358_v40 }
 0x16d   :  { %1383 = vmatprep.subr.bf16.mxu1 %v359_v38 }
 0x170   :  { %1384 = vmatpush3.bf16.msra.mxu1 %v359_v38 }
 0x173   :  { %1386 = vmatmul.mubr.bf16.vlgmr.msra.gmra.mrb[0].mxu1 %v1869_v41 }
 0x174   :  { %1389 = vmatprep.mubr.bf16.mxu1 %v1871_v42 }
 0x17b   :  { %1390 = vmatmul.mubr.bf16.gmra.mrb[4].mxu1 %v1875_v43 }
 0x17c   :  { %1393 = vmatprep.mubr.bf16.mxu1 %v1877_v44 }
 0x183   :  { %1394 = vmatmul.mubr.bf16.gmra.mrb[8].mxu1 %v1881_v45 }
 0x184   :  { %1397 = vmatprep.mubr.bf16.mxu1 %v1883_v46 }
 0x18b   :  { %1398 = vmatmul.mubr.bf16.gmra.mrb[12].mxu1 %v1887_v47 }
 0x18c   :  { %1449 = vmatprep.mubr.bf16.mxu1 %v1539_v16 }
 0x246   :  { %v1387_v57 = vpop.f32.mrb[0].mxu1 }
 0x247   :  { %v449_v58 = vpop.f32.mrb[1].mxu1  ;;  %v1899_v62 = vadd.f32 %v1387_v57, %v1893_v56 }
 0x248   :  { %v1896_v59 = vadd.f32 %v1893_v56, %v449_v58  ;;  %v1388_v60 = vpop.f32.mrb[2].mxu1 }
 0x249   :  { %v452_v61 = vpop.f32.mrb[3].mxu1  ;;  %v1907_v1 = vadd.f32 %v1388_v60, %v1893_v56  ;;  %v584_v4 = vmul.f32 %v1899_v62, %v1899_v62 }
 0x24a   :  { %v1902_v63 = vadd.f32 %v1893_v56, %v452_v61  ;;  %v582_v0 = vmul.f32 %v1896_v59, %v1896_v59 }
 0x24b   :  { %v585_v9 = vmul.f32 %v1907_v1, %v1907_v1 }
 0x24c   :  { %v561_v2 = vadd.f32 %v1902_v63, %v1896_v59  ;;  %v583_v3 = vmul.f32 %v1902_v63, %v1902_v63 }
 0x24e   :  { %v562_v5 = vadd.f32 %v561_v2, %v1899_v62  ;;  %v598_v6 = vadd.f32 %v583_v3, %v582_v0  ;;  %v1391_v7 = vpop.f32.mrb[4].mxu1 }
 0x24f   :  { %v465_v8 = vpop.f32.mrb[5].mxu1  ;;  %v474_v30 = vadd.f32 %v1391_v7, %v1893_v56 }
 0x250   :  { %v563_v10 = vadd.f32 %v562_v5, %v1907_v1  ;;  %v599_v11 = vadd.f32 %v598_v6, %v584_v4  ;;  %v1392_v12 = vpop.f32.mrb[6].mxu1  ;;  %v466_v31 = vadd.f32 %v1893_v56, %v465_v8 }
 0x251   :  { %v468_v13 = vpop.f32.mrb[7].mxu1  ;;  %v477_v32 = vadd.f32 %v1392_v12, %v1893_v56 }
 0x252   :  { %v576_v14 = vrot.slane %v563_v10, 4  ;;  %v600_v15 = vadd.f32 %v599_v11, %v585_v9  ;;  %v469_v33 = vadd.f32 %v1893_v56, %v468_v13 }
 0x254   :  { %v577_v16 = vadd.f32 %v576_v14, %v563_v10  ;;  %v613_v17 = vrot.slane %v600_v15, 4 }
 0x256   :  { %v578_v18 = vrot.slane %v577_v16, 2  ;;  %v614_v19 = vadd.f32 %v613_v17, %v600_v15  ;;  %v1395_v20 = vpop.f32.mrb[8].mxu1 }
 0x257   :  { %v481_v21 = vpop.f32.mrb[9].mxu1  ;;  %v490_v34 = vadd.f32 %v1395_v20, %v1893_v56 }
 0x258   :  { %v579_v22 = vadd.f32 %v578_v18, %v577_v16  ;;  %v615_v23 = vrot.slane %v614_v19, 2  ;;  %v1396_v24 = vpop.f32.mrb[10].mxu1  ;;  %v482_v35 = vadd.f32 %v1893_v56, %v481_v21 }
 0x259   :  { %v484_v25 = vpop.f32.mrb[11].mxu1  ;;  %v493_v38 = vadd.f32 %v1396_v24, %v1893_v56 }
 0x25a   :  { %v580_v26 = vrot.slane %v579_v22, 1  ;;  %v616_v27 = vadd.f32 %v615_v23, %v614_v19  ;;  %v485_v39 = vadd.f32 %v1893_v56, %v484_v25 }
 0x25c   :  { %v581_v28 = vadd.f32 %v580_v26, %v579_v22  ;;  %v617_v29 = vrot.slane %v616_v27, 1 }
 0x25e   :  { %v618_v36 = vadd.f32 %v617_v29, %v616_v27  ;;  %v1925_v37 = vmul.f32 0.03125, %v581_v28  ;;  %v1399_v40 = vpop.f32.mrb[12].mxu1 }
 0x25f   :  { %v506_v48 = vadd.f32 %v1399_v40, %v1893_v56  ;;  %v497_v49 = vpop.f32.mrb[13].mxu1 }
 0x260   :  { %v620_v50 = vmul.f32 0.03125, %v618_v36  ;;  %v621_v51 = vmul.f32 %v1925_v37, %v1925_v37  ;;  %v625_v52 = vsub.f32 %v1902_v63, %v1925_v37  ;;  %v630_v53 = vsub.f32 %v474_v30, %v1925_v37  ;;  %v1400_v54 = vpop.f32.mrb[14].mxu1 }
 0x261   :  { %v628_v55 = vsub.f32 %v466_v31, %v1925_v37  ;;  %v631_v57 = vsub.f32 %v477_v32, %v1925_v37  ;;  %v629_v58 = vsub.f32 %v469_v33, %v1925_v37  ;;  %v634_v60 = vsub.f32 %v490_v34, %v1925_v37  ;;  %v500_v61 = vpop.f32.mrb[15].mxu1  ;;  %v1238_v34 = vld [vmem:[%s1991_s5] ss:$0 sm:$0xff] }
 0x262   :  { %v622_v0 = vsub.f32 %v620_v50, %v621_v51  ;;  %v632_v2 = vsub.f32 %v482_v35, %v1925_v37  ;;  %v635_v3 = vsub.f32 %v493_v38, %v1925_v37  ;;  %v633_v4 = vsub.f32 %v485_v39, %v1925_v37 }
 0x263   :  { %v638_v63 = vsub.f32 %v506_v48, %v1925_v37  ;;  %v498_v5 = vadd.f32 %v1893_v56, %v497_v49  ;;  %v509_v6 = vadd.f32 %v1400_v54, %v1893_v56  ;;  %v501_v7 = vadd.f32 %v1893_v56, %v500_v61  ;;  %v1237_v56 = vld [vmem:[%s1990_s4] ss:$0 sm:$0xff] }
 0x264   :  { %v623_v8 = vmax.f32 %v622_v0, 0.0  ;;  %v624_v9 = vsub.f32 %v1896_v59, %v1925_v37  ;;  %v626_v10 = vsub.f32 %v1899_v62, %v1925_v37  ;;  %v627_v11 = vsub.f32 %v1907_v1, %v1925_v37 }
 0x265   :  { %v636_v12 = vsub.f32 %v498_v5, %v1925_v37  ;;  %v639_v13 = vsub.f32 %v509_v6, %v1925_v37  ;;  %v637_v14 = vsub.f32 %v501_v7, %v1925_v37 }
 0x266   :  { %v640_v15 = vadd.f32 1e-05, %v623_v8 }
 0x268   :  { %1563 = vrsqrt.f32 %v640_v15 }
 0x272   :  { %v1564_v16 = vpop.eup %1563 }
 0x273   :  { %v643_v59 = vmul.f32 %v1564_v16, %v625_v52  ;;  %v648_v17 = vmul.f32 %v1564_v16, %v630_v53  ;;  %v646_v18 = vmul.f32 %v1564_v16, %v628_v55  ;;  %v649_v62 = vmul.f32 %v1564_v16, %v631_v57 }
 0x274   :  { %v647_v19 = vmul.f32 %v1564_v16, %v629_v58  ;;  %v652_v20 = vmul.f32 %v1564_v16, %v634_v60  ;;  %v650_v1 = vmul.f32 %v1564_v16, %v632_v2  ;;  %v653_v21 = vmul.f32 %v1564_v16, %v635_v3 }
 0x275   :  { %v671_v22 = vmul.f32 %v1237_v56, %v648_v17  ;;  %v669_v23 = vmul.f32 %v1237_v56, %v646_v18  ;;  %v672_v24 = vmul.f32 %v1237_v56, %v649_v62  ;;  %v651_v25 = vmul.f32 %v1564_v16, %v633_v4 }
 0x276   :  { %v670_v26 = vmul.f32 %v1237_v56, %v647_v19  ;;  %v675_v27 = vmul.f32 %v1237_v56, %v652_v20  ;;  %v673_v28 = vmul.f32 %v1237_v56, %v650_v1  ;;  %v676_v29 = vmul.f32 %v1237_v56, %v653_v21 }
 0x277   :  { %v674_v30 = vmul.f32 %v1237_v56, %v651_v25  ;;  %v656_v31 = vmul.f32 %v1564_v16, %v638_v63  ;;  %v654_v32 = vmul.f32 %v1564_v16, %v636_v12  ;;  %v657_v33 = vmul.f32 %v1564_v16, %v639_v13 }
 0x278   :  { %v655_v35 = vmul.f32 %v1564_v16, %v637_v14  ;;  %v642_v36 = vmul.f32 %v1564_v16, %v624_v9  ;;  %v666_v37 = vmul.f32 %v1237_v56, %v643_v59  ;;  %v644_v38 = vmul.f32 %v1564_v16, %v626_v10 }
 0x279   :  { %v679_v39 = vmul.f32 %v1237_v56, %v656_v31  ;;  %v677_v40 = vmul.f32 %v1237_v56, %v654_v32  ;;  %v680_v48 = vmul.f32 %v1237_v56, %v657_v33  ;;  %v645_v49 = vmul.f32 %v1564_v16, %v627_v11  ;;  %v1556_v31 = vld [vmem:[#allocation10 + $0x8] sm:$0xff]   ;;  %v1557_v32 = vld [vmem:[#allocation10 + $0x10] sm:$0xff]   ;;  %v1558_v33 = vld [vmem:[#allocation10 + $0x18] sm:$0xff]  }
 0x27a   :  { %v678_v50 = vmul.f32 %v1237_v56, %v655_v35  ;;  %v665_v51 = vmul.f32 %v1237_v56, %v642_v36  ;;  %v689_v52 = vadd.f32 %v1238_v34, %v666_v37  ;;  %v667_v53 = vmul.f32 %v1237_v56, %v644_v38  ;;  %v1560_v35 = vld [vmem:[#allocation10 + $0x28] sm:$0xff]  }
 0x27b   :  { %v668_v54 = vmul.f32 %v1237_v56, %v645_v49  ;;  %v692_v55 = vadd.f32 %v1238_v34, %v669_v23  ;;  %v693_v57 = vadd.f32 %v1238_v34, %v670_v26  ;;  %v694_v58 = vadd.f32 %v1238_v34, %v671_v22 }
 0x27c   :  { %v688_v60 = vadd.f32 %v1238_v34, %v665_v51  ;;  %v705_v61 = vmax.f32 %v689_v52, 0.0  ;;  %v690_v0 = vadd.f32 %v1238_v34, %v667_v53  ;;  %v695_v2 = vadd.f32 %v1238_v34, %v672_v24 }
 0x27d   :  { %v691_v3 = vadd.f32 %v1238_v34, %v668_v54  ;;  %v708_v4 = vmax.f32 %v692_v55, 0.0  ;;  %v709_v63 = vmax.f32 %v693_v57, 0.0  ;;  %v710_v5 = vmax.f32 %v694_v58, 0.0 }
 0x27e   :  { %v704_v6 = vmax.f32 %v688_v60, 0.0  ;;  %v706_v7 = vmax.f32 %v690_v0, 0.0  ;;  %v711_v8 = vmax.f32 %v695_v2, 0.0  ;;  %v696_v9 = vadd.f32 %v1238_v34, %v673_v28 }
 0x27f   :  { %v707_v10 = vmax.f32 %v691_v3, 0.0  ;;  %v722_v11 = vpack.c.bf16 %v709_v63, %v708_v4  ;;  %v697_v12 = vadd.f32 %v1238_v34, %v674_v30  ;;  %v698_v13 = vadd.f32 %v1238_v34, %v675_v27 }
 0x280   :  { %v720_v14 = vpack.c.bf16 %v705_v61, %v704_v6  ;;  %v723_v15 = vpack.c.bf16 %v711_v8, %v710_v5  ;;  %v712_v16 = vmax.f32 %v696_v9, 0.0  ;;  %v699_v56 = vadd.f32 %v1238_v34, %v676_v29  ;;  %v1555_v29 = vld [vmem:[#allocation10] sm:$0xff]  }
 0x281   :  { %v721_v59 = vpack.c.bf16 %v707_v10, %v706_v7  ;;  %v713_v17 = vmax.f32 %v697_v12, 0.0  ;;  %v714_v18 = vmax.f32 %v698_v13, 0.0  ;;  %v700_v62 = vadd.f32 %v1238_v34, %v677_v40  ;;  %1465 = vmatprep.subr.bf16.mxu0 %v1555_v29 }
 0x282   :  { %1417 = vmatprep.mubr.bf16.mxu0 %v720_v14  ;;  %v715_v19 = vmax.f32 %v699_v56, 0.0  ;;  %v701_v20 = vadd.f32 %v1238_v34, %v678_v50  ;;  %v702_v1 = vadd.f32 %v1238_v34, %v679_v39  ;;  %v703_v21 = vadd.f32 %v1238_v34, %v680_v48  ;;  %v1559_v34 = vld [vmem:[#allocation10 + $0x20] sm:$0xff]  }
 0x283   :  { %1418 = vmatmul.mubr.bf16.vlgmr.msra.gmra.mrb[16].mxu0 %v721_v59  ;;  %v724_v22 = vpack.c.bf16 %v713_v17, %v712_v16  ;;  %v716_v23 = vmax.f32 %v700_v62, 0.0 }
 0x284   :  { %1421 = vmatprep.mubr.bf16.mxu0 %v722_v11  ;;  %v725_v24 = vpack.c.bf16 %v715_v19, %v714_v18  ;;  %v717_v25 = vmax.f32 %v701_v20, 0.0  ;;  %v718_v26 = vmax.f32 %v702_v1, 0.0  ;;  %v719_v27 = vmax.f32 %v703_v21, 0.0  ;;  %1466 = vmatpush3.bf16.msra.mxu0 %v1555_v29 }
 0x285   :  { %1467 = vmatprep.subr.bf16.mxu0 %v1556_v31 }
 0x286   :  { %v726_v28 = vpack.c.bf16 %v717_v25, %v716_v23  ;;  %v727_v30 = vpack.c.bf16 %v719_v27, %v718_v26 }
 0x288   :  { %1468 = vmatpush3.bf16.msra.mxu0 %v1556_v31 }
 0x289   :  { %1469 = vmatprep.subr.bf16.mxu0 %v1557_v32 }
 0x28b   :  { %1422 = vmatmul.mubr.bf16.gmra.mrb[20].mxu0 %v723_v15 }
 0x28c   :  { %1425 = vmatprep.mubr.bf16.mxu0 %v724_v22  ;;  %1470 = vmatpush3.bf16.msra.mxu0 %v1557_v32 }
 0x28d   :  { %1471 = vmatprep.subr.bf16.mxu0 %v1558_v33 }
 0x290   :  { %1472 = vmatpush3.bf16.msra.mxu0 %v1558_v33 }
 0x291   :  { %1473 = vmatprep.subr.bf16.mxu0 %v1559_v34 }
 0x293   :  { %1426 = vmatmul.mubr.bf16.gmra.mrb[24].mxu0 %v725_v24 }
 0x294   :  { %1429 = vmatprep.mubr.bf16.mxu0 %v726_v28  ;;  %1474 = vmatpush3.bf16.msra.mxu0 %v1559_v34 }
 0x295   :  { %1475 = vmatprep.subr.bf16.mxu0 %v1560_v35 }
 0x298   :  { %1476 = vmatpush3.bf16.msra.mxu0 %v1560_v35 }
 0x29b   :  { %1430 = vmatmul.mubr.bf16.gmra.mrb[28].mxu0 %v727_v30 }
 0x356   :  { %v1419_v36 = vpop.f32.mrb[16].mxu0 }
 0x357   :  { %v826_v37 = vpop.f32.mrb[17].mxu0 }
 0x358   :  { %v1420_v38 = vpop.f32.mrb[18].mxu0 }
 0x359   :  { %v890_v39 = vpack.c.bf16 %v1420_v38, %v1419_v36  ;;  %v829_v40 = vpop.f32.mrb[19].mxu0 }
 0x35a   :  { %v889_v48 = vpack.c.bf16 %v829_v40, %v826_v37 }
 0x35c   :  { %1433 = vmatprep.subr.bf16.mxu1 %v889_v48 }
 0x35d   :  { %1434 = vmatpush3.bf16.msra.mxu1 %v889_v48 }
 0x35e   :  { %v1423_v49 = vpop.f32.mrb[20].mxu0  ;;  %1435 = vmatprep.subr.bf16.mxu1 %v890_v39 }
 0x35f   :  { %v842_v50 = vpop.f32.mrb[21].mxu0 }
 0x360   :  { %v1424_v51 = vpop.f32.mrb[22].mxu0 }
 0x361   :  { %v892_v52 = vpack.c.bf16 %v1424_v51, %v1423_v49  ;;  %v845_v53 = vpop.f32.mrb[23].mxu0  ;;  %1436 = vmatpush3.bf16.msra.mxu1 %v890_v39  ;;  %v1248_v39 = vld [vmem:[%s1997_s11] ss:$0 sm:$0xff]  ;;  %s1712_s11 = smov [#allocation11]  }
 0x362   :  { %v891_v54 = vpack.c.bf16 %v845_v53, %v842_v50  ;;  %s1198_s24 = sshll.u32 %s1712_s11, 4  ;;  %s1199_s24 = int_to_ptr.vmem [resolvable:$true] %s1198_s24 }
 0x363   :  { %s1675_s1 = scalar_lea.vmem %s1199_s24, 2048  ;;  %p1680_p13 = scmp.lt.s32.totalorder %s1199_s24, %s1199_s24 }
 0x364   :  { %1437 = vmatprep.subr.bf16.mxu1 %v891_v54  ;;  %p1676_p12 = scmp.ne.s32.totalorder %s1199_s24, %s1675_s1  ;;  %p1681_p0 = scmp.lt.s32.totalorder %s1675_s1, %s1675_s1 }
 0x365   :  { %1438 = vmatpush3.bf16.msra.mxu1 %v891_v54 }
 0x366   :  { %v1427_v55 = vpop.f32.mrb[24].mxu0  ;;  %1439 = vmatprep.subr.bf16.mxu1 %v892_v52  ;;  %p1682_p1 = por %p1681_p0, %p1680_p13 }
 0x367   :  { %v858_v57 = vpop.f32.mrb[25].mxu0 }
 0x368   :  { %v1428_v58 = vpop.f32.mrb[26].mxu0  ;;  %p1683_p2 = pnand %p1682_p1, %p1676_p12 }
 0x369   :  { %v894_v60 = vpack.c.bf16 %v1428_v58, %v1427_v55  ;;  %v861_v61 = vpop.f32.mrb[27].mxu0  ;;  %1440 = vmatpush3.bf16.msra.mxu1 %v892_v52 }
 0x36a   :  { %v893_v0 = vpack.c.bf16 %v861_v61, %v858_v57 }
 0x36c   :  { %1441 = vmatprep.subr.bf16.mxu1 %v893_v0 }
 0x36d   :  { %1442 = vmatpush3.bf16.msra.mxu1 %v893_v0 }
 0x36e   :  { %v1431_v2 = vpop.f32.mrb[28].mxu0  ;;  %1443 = vmatprep.subr.bf16.mxu1 %v894_v60 }
 0x36f   :  { %v874_v3 = vpop.f32.mrb[29].mxu0 }
 0x370   :  { %v1432_v4 = vpop.f32.mrb[30].mxu0 }
 0x371   :  { %v896_v63 = vpack.c.bf16 %v1432_v4, %v1431_v2  ;;  %v877_v5 = vpop.f32.mrb[31].mxu0  ;;  %1444 = vmatpush3.bf16.msra.mxu1 %v894_v60 }
 0x372   :  { %v895_v6 = vpack.c.bf16 %v877_v5, %v874_v3 }
 0x374   :  { %1445 = vmatprep.subr.bf16.mxu1 %v895_v6 }
 0x375   :  { %1446 = vmatpush3.bf16.msra.mxu1 %v895_v6 }
 0x376   :  { %1447 = vmatprep.subr.bf16.mxu1 %v896_v63 }
 0x379   :  { %1448 = vmatpush3.bf16.msra.mxu1 %v896_v63 }
 0x37a   :  { %1497 = vmatprep.subr.bf16.mxu1 %v1555_v29 }
 0x37c   :  { %1450 = vmatmul.mubr.bf16.vlgmr.msra.gmra.mrb[16].mxu1 %v1869_v41  ;;  %v1561_v41 = vld [vmem:[#allocation10 + $0x30] sm:$0xff]  }
 0x37d   :  { %1453 = vmatprep.mubr.bf16.mxu1 %v1871_v42  ;;  %1505 = vmatpush3.bf16.msra.mxu1 %v1555_v29  ;;  %v1562_v42 = vld [vmem:[#allocation10 + $0x38] sm:$0xff]  }
 0x37e   :  { %1498 = vmatprep.subr.bf16.mxu1 %v1556_v31  ;;  %1477 = vmatprep.subr.bf16.mxu0 %v1561_v41 }
 0x37f   :  { %1478 = vmatpush3.bf16.msra.mxu0 %v1561_v41 }
 0x380   :  { %1479 = vmatprep.subr.bf16.mxu0 %v1562_v42 }
 0x381   :  { %1506 = vmatpush3.bf16.msra.mxu1 %v1556_v31 }
 0x382   :  { %1499 = vmatprep.subr.bf16.mxu1 %v1557_v32 }
 0x383   :  { %1480 = vmatpush3.bf16.msra.mxu0 %v1562_v42 }
 0x384   :  { %1454 = vmatmul.mubr.bf16.gmra.mrb[20].mxu1 %v1875_v43 }
 0x385   :  { %1457 = vmatprep.mubr.bf16.mxu1 %v1877_v44  ;;  %1507 = vmatpush3.bf16.msra.mxu1 %v1557_v32  ;;  %v1247_v44 = vld [vmem:[%s1993_s7] ss:$0 sm:$0xff] }
 0x386   :  { %1500 = vmatprep.subr.bf16.mxu1 %v1558_v33 }
 0x389   :  { %1508 = vmatpush3.bf16.msra.mxu1 %v1558_v33 }
 0x38a   :  { %1501 = vmatprep.subr.bf16.mxu1 %v1559_v34 }
 0x38c   :  { %1458 = vmatmul.mubr.bf16.gmra.mrb[24].mxu1 %v1881_v45 }
 0x38d   :  { %1461 = vmatprep.mubr.bf16.mxu1 %v1883_v46  ;;  %1509 = vmatpush3.bf16.msra.mxu1 %v1559_v34 }
 0x38e   :  { %1502 = vmatprep.subr.bf16.mxu1 %v1560_v35 }
 0x391   :  { %1510 = vmatpush3.bf16.msra.mxu1 %v1560_v35 }
 0x392   :  { %1503 = vmatprep.subr.bf16.mxu1 %v1561_v41 }
 0x394   :  { %1462 = vmatmul.mubr.bf16.gmra.mrb[28].mxu1 %v1887_v47 }
 0x395   :  { %1511 = vmatpush3.bf16.msra.mxu1 %v1561_v41 }
 0x396   :  { %1504 = vmatprep.subr.bf16.mxu1 %v1562_v42 }
 0x399   :  { %1512 = vmatpush3.bf16.msra.mxu1 %v1562_v42 }
 0x44f   :  { %v1451_v43 = vpop.f32.mrb[16].mxu1 }
 0x450   :  { %v938_v45 = vpop.f32.mrb[17].mxu1  ;;  %v947_v7 = vadd.f32 %v1451_v43, %v1247_v44 }
 0x451   :  { %v1452_v46 = vpop.f32.mrb[18].mxu1  ;;  %v939_v9 = vadd.f32 %v1247_v44, %v938_v45 }
 0x452   :  { %v950_v8 = vadd.f32 %v1452_v46, %v1247_v44  ;;  %v941_v47 = vpop.f32.mrb[19].mxu1 }
 0x453   :  { %v942_v10 = vadd.f32 %v1247_v44, %v941_v47 }
 0x454   :  { %v1002_v11 = vpack.c.bf16 %v950_v8, %v947_v7 }
 0x455   :  { %v1001_v12 = vpack.c.bf16 %v942_v10, %v939_v9 }
 0x457   :  { %v1455_v13 = vpop.f32.mrb[20].mxu1  ;;  %1481 = vmatprep.mubr.bf16.mxu0 %v1001_v12 }
 0x458   :  { %v954_v14 = vpop.f32.mrb[21].mxu1  ;;  %1482 = vmatmul.mubr.bf16.vlgmr.msra.gmra.mrb[32].mxu0 %v1002_v11  ;;  %v963_v16 = vadd.f32 %v1455_v13, %v1247_v44 }
 0x459   :  { %v1456_v15 = vpop.f32.mrb[22].mxu1  ;;  %v955_v17 = vadd.f32 %v1247_v44, %v954_v14 }
 0x45a   :  { %v966_v56 = vadd.f32 %v1456_v15, %v1247_v44  ;;  %v957_v59 = vpop.f32.mrb[23].mxu1 }
 0x45b   :  { %v958_v18 = vadd.f32 %v1247_v44, %v957_v59 }
 0x45c   :  { %v1004_v62 = vpack.c.bf16 %v966_v56, %v963_v16 }
 0x45d   :  { %v1003_v19 = vpack.c.bf16 %v958_v18, %v955_v17 }
 0x45f   :  { %v1459_v20 = vpop.f32.mrb[24].mxu1  ;;  %1485 = vmatprep.mubr.bf16.mxu0 %v1003_v19 }
 0x460   :  { %v970_v1 = vpop.f32.mrb[25].mxu1  ;;  %1486 = vmatmul.mubr.bf16.gmra.mrb[36].mxu0 %v1004_v62  ;;  %v979_v22 = vadd.f32 %v1459_v20, %v1247_v44 }
 0x461   :  { %v1460_v21 = vpop.f32.mrb[26].mxu1  ;;  %v971_v25 = vadd.f32 %v1247_v44, %v970_v1 }
 0x462   :  { %v982_v23 = vadd.f32 %v1460_v21, %v1247_v44  ;;  %v973_v24 = vpop.f32.mrb[27].mxu1 }
 0x463   :  { %v974_v26 = vadd.f32 %v1247_v44, %v973_v24 }
 0x464   :  { %v1006_v27 = vpack.c.bf16 %v982_v23, %v979_v22 }
 0x465   :  { %v1005_v28 = vpack.c.bf16 %v974_v26, %v971_v25 }
 0x467   :  { %v1463_v30 = vpop.f32.mrb[28].mxu1  ;;  %1489 = vmatprep.mubr.bf16.mxu1 %v1005_v28 }
 0x468   :  { %v986_v29 = vpop.f32.mrb[29].mxu1  ;;  %1490 = vmatmul.mubr.bf16.vlgmr.msra.gmra.mrb[32].mxu1 %v1006_v27  ;;  %v995_v32 = vadd.f32 %v1463_v30, %v1247_v44 }
 0x469   :  { %v1464_v31 = vpop.f32.mrb[30].mxu1  ;;  %v987_v35 = vadd.f32 %v1247_v44, %v986_v29 }
 0x46a   :  { %v998_v33 = vadd.f32 %v1464_v31, %v1247_v44  ;;  %v989_v34 = vpop.f32.mrb[31].mxu1 }
 0x46b   :  { %v990_v36 = vadd.f32 %v1247_v44, %v989_v34 }
 0x46c   :  { %v1008_v37 = vpack.c.bf16 %v998_v33, %v995_v32 }
 0x46d   :  { %v1007_v38 = vpack.c.bf16 %v990_v36, %v987_v35 }
 0x46f   :  { %1493 = vmatprep.mubr.bf16.mxu1 %v1007_v38 }
 0x470   :  { %1494 = vmatmul.mubr.bf16.gmra.mrb[36].mxu1 %v1008_v37 }
 0x52b   :  { %v1483_v40 = vpop.f32.mrb[32].mxu0 }
 0x52c   :  { %v1123_v48 = vadd.f32 %v1483_v40, %v1248_v39  ;;  %v1114_v49 = vpop.f32.mrb[33].mxu0 }
 0x52d   :  { %v1115_v50 = vadd.f32 %v1248_v39, %v1114_v49  ;;  %v1484_v51 = vpop.f32.mrb[34].mxu0 }
 0x52e   :  { %1179 = vst [vmem:[#allocation11 + $0x10] sm:$0xff] %v1123_v48  ;;  %v1126_v52 = vadd.f32 %v1484_v51, %v1248_v39  ;;  %v1117_v53 = vpop.f32.mrb[35].mxu0 }
 0x52f   :  { %1177 = vst [vmem:[#allocation11] sm:$0xff] %v1115_v50  ;;  %v1118_v54 = vadd.f32 %v1248_v39, %v1117_v53 }
 0x530   :  { %1180 = vst [vmem:[#allocation11 + $0x18] sm:$0xff] %v1126_v52 }
 0x531   :  { %1178 = vst [vmem:[#allocation11 + $0x8] sm:$0xff] %v1118_v54 }
 0x533   :  { %v1487_v55 = vpop.f32.mrb[36].mxu0 }
 0x534   :  { %v1139_v57 = vadd.f32 %v1487_v55, %v1248_v39  ;;  %v1130_v58 = vpop.f32.mrb[37].mxu0 }
 0x535   :  { %v1131_v60 = vadd.f32 %v1248_v39, %v1130_v58  ;;  %v1488_v61 = vpop.f32.mrb[38].mxu0 }
 0x536   :  { %1183 = vst [vmem:[#allocation11 + $0x30] sm:$0xff] %v1139_v57  ;;  %v1142_v0 = vadd.f32 %v1488_v61, %v1248_v39  ;;  %v1133_v2 = vpop.f32.mrb[39].mxu0 }
 0x537   :  { %1181 = vst [vmem:[#allocation11 + $0x20] sm:$0xff] %v1131_v60  ;;  %v1134_v3 = vadd.f32 %v1248_v39, %v1133_v2 }
 0x538   :  { %1184 = vst [vmem:[#allocation11 + $0x38] sm:$0xff] %v1142_v0 }
 0x539   :  { %1182 = vst [vmem:[#allocation11 + $0x28] sm:$0xff] %v1134_v3 }
 0x53b   :  { %v1491_v4 = vpop.f32.mrb[32].mxu1 }
 0x53c   :  { %v1155_v63 = vadd.f32 %v1491_v4, %v1248_v39  ;;  %v1146_v5 = vpop.f32.mrb[33].mxu1 }
 0x53d   :  { %v1147_v6 = vadd.f32 %v1248_v39, %v1146_v5  ;;  %v1492_v41 = vpop.f32.mrb[34].mxu1 }
 0x53e   :  { %1187 = vst [vmem:[#allocation11 + $0x50] sm:$0xff] %v1155_v63  ;;  %v1158_v42 = vadd.f32 %v1492_v41, %v1248_v39  ;;  %v1149_v43 = vpop.f32.mrb[35].mxu1 }
 0x53f   :  { %1185 = vst [vmem:[#allocation11 + $0x40] sm:$0xff] %v1147_v6  ;;  %v1150_v44 = vadd.f32 %v1248_v39, %v1149_v43 }
 0x540   :  { %1188 = vst [vmem:[#allocation11 + $0x58] sm:$0xff] %v1158_v42 }
 0x541   :  { %1186 = vst [vmem:[#allocation11 + $0x48] sm:$0xff] %v1150_v44 }
 0x543   :  { %v1495_v45 = vpop.f32.mrb[36].mxu1 }
 0x544   :  { %v1171_v46 = vadd.f32 %v1495_v45, %v1248_v39  ;;  %v1162_v7 = vpop.f32.mrb[37].mxu1 }
 0x545   :  { %v1163_v8 = vadd.f32 %v1248_v39, %v1162_v7  ;;  %v1496_v47 = vpop.f32.mrb[38].mxu1 }
 0x546   :  { %1191 = vst [vmem:[#allocation11 + $0x70] sm:$0xff] %v1171_v46  ;;  %v1174_v9 = vadd.f32 %v1496_v47, %v1248_v39  ;;  %v1165_v10 = vpop.f32.mrb[39].mxu1 }
 0x547   :  { %1189 = vst [vmem:[#allocation11 + $0x60] sm:$0xff] %v1163_v8  ;;  %v1166_v11 = vadd.f32 %v1248_v39, %v1165_v10 }
 0x548   :  { %1192 = vst [vmem:[#allocation11 + $0x78] sm:$0xff] %v1174_v9 }
 0x549   :  { %1190 = vst [vmem:[#allocation11 + $0x68] sm:$0xff] %v1166_v11 }
 0x54a   :  { %1686 = shalt.err (!%p1683_p2)
}
 0x54b   :  { %s1687_s27 = scalar_lea.hbm %s1998_s12, 2048 }
 0x54c   :  { %p1688_p3 = scmp.ne.s32.totalorder %s1998_s12, %s1687_s27  ;;  %p1691_p4 = scmp.lt.u32.totalorder %s1687_s27, %s1998_s12 }
 0x54e   :  { %p1693_p5 = pnand %p1691_p4, %p1688_p3 }
 0x550   :  { %1696 = shalt.err (!%p1693_p5)
}
 0x551   :  { %s1713_s15 = smov 128   ;;  %s1714_s16 = smov 8  }
 0x552   :  { %1204 = dma.vmem_to_hbm [thread:$0]  %s1199_s24, 2048, %s1998_s12, [#allocation4], %s1713_s15, %s1713_s15, %s1714_s16  }
 0x553   :  { %1703 = dma.done.wait [#allocation4], 2048  }
 0x554   :  { %1704 = vsyncadd [#allocation4], 4294965248 }
 0x555   :  { %1208 = vsyncpa [#allocation3], 1 }
 0x556   :  { %1209 = vsyncpa [#allocation6], 1 }
 0x557   :  { %1210 = vsyncpa [#allocation9], 1 }
 0x558   :  { %1211 = vsyncpa [#allocation4], 1 }

</bundles_post_ra>
